<compile_context>
chip_gen: v7x
topology: tpu7x:2x2x1
jax: 0.10.0
libtpu: 0.0.40
codegen_flags: <defaults>
</compile_context>

<pallas_src>
import functools

import jax
import jax.numpy as jnp
import numpy as np
from jax.experimental import pallas as pl
from jax.experimental.pallas import tpu as pltpu


def _resblock_kernel(p1_ref, w1_ref, b1_ref, w2_ref, b2_ref, o_ref, *, H, W):
    # p1_ref : (9*C, H*W) f32  im2col patches of the reflect-padded input,
    #                          tap-major rows (tap t = ky*3 + kx; t=4 is x).
    # w1_ref : (C, 9*C)   f32  conv1 weight, minor order (ky, kx, c_in).
    # b1_ref : (C, 1)     f32
    # w2_ref : (9, C, C)  f32  conv2 weight per tap: w2_ref[t] = w2[:, :, ky, kx].
    # b2_ref : (C, 1)     f32
    # o_ref  : (C, H*W)   f32  lane-dense output tile.
    C, HW = o_ref.shape
    inv_hw = 1.0 / HW

    def instance_norm(a):  # InstanceNorm2d(dim), affine=False, eps=1e-5
        mu = jnp.sum(a, axis=1, keepdims=True) * inv_hw
        d = a - mu
        var = jnp.sum(d * d, axis=1, keepdims=True) * inv_hw
        return d * jax.lax.rsqrt(var + 1e-5)

    # ---- conv1 -> InstanceNorm -> ReLU (single MXU matmul on prebuilt patches)
    h = jnp.dot(w1_ref[...], p1_ref[...], preferred_element_type=jnp.float32)
    h = h + b1_ref[...]
    h = jnp.maximum(instance_norm(h), 0.0)              # (C, HW), lane-dense

    # ---- conv2: reflect-pad-by-1 taps built with lane rolls (stay in (C, HW)).
    col = jax.lax.broadcasted_iota(jnp.int32, (C, HW), 1)
    xcol = col % W
    m_left = xcol == 0                 # x == 0   -> reflect to x = 1
    m_right = xcol == W - 1            # x == W-1 -> reflect to x = W-2
    m_top = col < W                    # y == 0   -> reflect to y = 1
    m_bot = col >= (H - 1) * W         # y == H-1 -> reflect to y = H-2

    h_next = pltpu.roll(h, HW - W, axis=1)    # value at pos + W  (row y+1)
    h_prev = pltpu.roll(h, W, axis=1)         # value at pos - W  (row y-1)
    hd_rows = (
        jnp.where(m_top, h_next, h_prev),     # ky = 0  (dy = -1)
        h,                                    # ky = 1  (dy =  0)
        jnp.where(m_bot, h_prev, h_next),     # ky = 2  (dy = +1)
    )

    acc = jnp.zeros((C, HW), jnp.float32)
    for ky, hd in enumerate(hd_rows):
        g_next = pltpu.roll(hd, HW - 1, axis=1)   # value at pos + 1  (x+1)
        g_prev = pltpu.roll(hd, 1, axis=1)        # value at pos - 1  (x-1)
        taps = (
            jnp.where(m_left, g_next, g_prev),    # kx = 0  (dx = -1)
            hd,                                   # kx = 1  (dx =  0)
            jnp.where(m_right, g_prev, g_next),   # kx = 2  (dx = +1)
        )
        for kx, t in enumerate(taps):
            acc = acc + jnp.dot(w2_ref[3 * ky + kx], t,
                                preferred_element_type=jnp.float32)

    h2 = instance_norm(acc + b2_ref[...])

    # ---- residual add: x in (C, HW) form is the center tap of p1.
    o_ref[...] = (p1_ref[4 * C:5 * C, :] + h2).astype(o_ref.dtype)


def resblock_pallas(x, w1, b1, w2, b2):
    N, C, H, W = x.shape
    HW = H * W

    # conv1 im2col done by XLA in HBM, before the per-sample DMA (review #1).
    xp = jnp.pad(x, ((0, 0), (0, 0), (1, 1), (1, 1)), mode="reflect")
    p1 = jnp.concatenate(
        [xp[:, :, ky:ky + H, kx:kx + W].reshape(N, C, HW)
         for ky in range(3) for kx in range(3)],
        axis=1).astype(jnp.float32)                        # (N, 9C, HW)

    # conv1 weight as (C_out, 9*C_in), minor order (ky, kx, c_in) to match the
    # patch stacking; conv2 weight as one (C_out, C_in) matrix per tap.
    w1f = w1.transpose(0, 2, 3, 1).reshape(C, 9 * C).astype(jnp.float32)
    w2r = w2.transpose(2, 3, 0, 1).reshape(9, C, C).astype(jnp.float32)
    b1c = b1.reshape(C, 1).astype(jnp.float32)
    b2c = b2.reshape(C, 1).astype(jnp.float32)

    kernel = functools.partial(_resblock_kernel, H=H, W=W)

    out = pl.pallas_call(
        kernel,
        out_shape=jax.ShapeDtypeStruct((N, C, HW), x.dtype),
        grid=(N,),
        in_specs=[
            pl.BlockSpec((pl.Squeezed(), 9 * C, HW), lambda n: (n, 0, 0)),
            pl.BlockSpec((C, 9 * C), lambda n: (0, 0)),
            pl.BlockSpec((C, 1), lambda n: (0, 0)),
            pl.BlockSpec((9, C, C), lambda n: (0, 0, 0)),
            pl.BlockSpec((C, 1), lambda n: (0, 0)),
        ],
        out_specs=pl.BlockSpec((pl.Squeezed(), C, HW), lambda n: (n, 0, 0)),
        compiler_params=pltpu.CompilerParams(
            # v7x: one sample per TensorCore; v5e/v6e: second step is ~0.35 us.
            dimension_semantics=("parallel",),
        ),
    )(p1, w1f, b1c, w2r, b2c)
    return out.reshape(N, C, H, W)


def resblock_ref(x, w1, b1, w2, b2):
    """Pure-JAX f32 reference (mirrors the PyTorch module semantics)."""
    def pad(a):
        return jnp.pad(a, ((0, 0), (0, 0), (1, 1), (1, 1)), mode="reflect")

    def conv(a, w, b):
        y = jax.lax.conv_general_dilated(
            pad(a), w, window_strides=(1, 1), padding="VALID",
            dimension_numbers=("NCHW", "OIHW", "NCHW"))
        return y + b[None, :, None, None]

    def inorm(a):
        mu = a.mean(axis=(2, 3), keepdims=True)
        var = ((a - mu) ** 2).mean(axis=(2, 3), keepdims=True)
        return (a - mu) * jax.lax.rsqrt(var + 1e-5)

    h = jnp.maximum(inorm(conv(x, w1, b1)), 0.0)
    h = inorm(conv(h, w2, b2))
    return x + h


if __name__ == "__main__":
    N, C, H, W = 2, 4, 16, 16  # dim=4

    key = jax.random.PRNGKey(0)
    kx_, kw1, kb1, kw2, kb2 = jax.random.split(key, 5)

    x = jax.random.normal(kx_, (N, C, H, W), jnp.float32)
    fan_in = C * 3 * 3
    bound = 1.0 / np.sqrt(fan_in)
    w1 = jax.random.uniform(kw1, (C, C, 3, 3), jnp.float32, -bound, bound)
    b1 = jax.random.uniform(kb1, (C,), jnp.float32, -bound, bound)
    w2 = jax.random.uniform(kw2, (C, C, 3, 3), jnp.float32, -bound, bound)
    b2 = jax.random.uniform(kb2, (C,), jnp.float32, -bound, bound)

    out = jax.block_until_ready(resblock_pallas(x, w1, b1, w2, b2))
    ref = jax.block_until_ready(resblock_ref(x, w1, b1, w2, b2))

    # Matmul operands are now f32 (per the review the kernel is not MXU-bound),
    # so the tolerance is tightened vs. the previous bf16 version.
    np.testing.assert_allclose(np.asarray(out), np.asarray(ref),
                               rtol=2e-2, atol=2e-2)

    print("KERNEL_OK")
</pallas_src>

<mosaic_0001>
module attributes {stable_mosaic.version = 11 : i64} {
  func.func @_resblock_kernel(%arg0: i32, %arg1: memref<1x36x256xf32, #tpu.memory_space<vmem>>, %arg2: memref<4x36xf32, #tpu.memory_space<vmem>>, %arg3: memref<4x1xf32, #tpu.memory_space<vmem>>, %arg4: memref<9x4x4xf32, #tpu.memory_space<vmem>>, %arg5: memref<4x1xf32, #tpu.memory_space<vmem>>, %arg6: memref<1x4x256xf32, #tpu.memory_space<vmem>>) attributes {dimension_semantics = [#tpu.dimension_semantics<parallel>], iteration_bounds = array<i64: 2>, scalar_prefetch = 0 : i64, scratch_operands = 0 : i64, tpu.core_type = #tpu.core_type<tc>, window_params = [{transform_indices = @transform_0, window_bounds = array<i64: 1, 36, 256>}, {pipeline_mode = #tpu.pipeline_mode<synchronous>, transform_indices = @transform_1, window_bounds = array<i64: 4, 36>}, {pipeline_mode = #tpu.pipeline_mode<synchronous>, transform_indices = @transform_2, window_bounds = array<i64: 4, 1>}, {pipeline_mode = #tpu.pipeline_mode<synchronous>, transform_indices = @transform_3, window_bounds = array<i64: 9, 4, 4>}, {pipeline_mode = #tpu.pipeline_mode<synchronous>, transform_indices = @transform_4, window_bounds = array<i64: 4, 1>}, {transform_indices = @transform_5, window_bounds = array<i64: 1, 4, 256>}]} {
    %c0 = arith.constant 0 : index
    %c0_0 = arith.constant 0 : index
    %0 = vector.load %arg2[%c0, %c0_0] : memref<4x36xf32, #tpu.memory_space<vmem>>, vector<4x36xf32>
    %c0_1 = arith.constant 0 : index
    %c0_2 = arith.constant 0 : index
    %c0_3 = arith.constant 0 : index
    %1 = vector.load %arg1[%c0_1, %c0_2, %c0_3] : memref<1x36x256xf32, #tpu.memory_space<vmem>>, vector<1x36x256xf32>
    %2 = vector.shape_cast %1 : vector<1x36x256xf32> to vector<36x256xf32>
    %cst = arith.constant dense<0.000000e+00> : vector<4x256xf32>
    %3 = tpu.matmul %0, %2, %cst {dimension_numbers = #tpu.dot_dimension_numbers<[1], [0], [0], [1], [0, 0, 1, 1], [], []>} : vector<4x36xf32>, vector<36x256xf32>, vector<4x256xf32> -> vector<4x256xf32>
    %c0_4 = arith.constant 0 : index
    %c0_5 = arith.constant 0 : index
    %4 = vector.load %arg3[%c0_4, %c0_5] : memref<4x1xf32, #tpu.memory_space<vmem>>, vector<4x1xf32>
    %5 = vector.broadcast %4 : vector<4x1xf32> to vector<4x256xf32>
    %6 = arith.addf %3, %5 : vector<4x256xf32>
    %cst_6 = arith.constant dense<0.000000e+00> : vector<4xf32>
    %7 = vector.multi_reduction <add>, %6, %cst_6 [1] : vector<4x256xf32> to vector<4xf32>
    %8 = vector.shape_cast %7 : vector<4xf32> to vector<4x1xf32>
    %cst_7 = arith.constant 3.906250e-03 : f32
    %9 = vector.broadcast %cst_7 : f32 to vector<4x1xf32>
    %10 = arith.mulf %8, %9 : vector<4x1xf32>
    %11 = vector.broadcast %10 : vector<4x1xf32> to vector<4x256xf32>
    %12 = arith.subf %6, %11 : vector<4x256xf32>
    %13 = arith.mulf %12, %12 : vector<4x256xf32>
    %cst_8 = arith.constant dense<0.000000e+00> : vector<4xf32>
    %14 = vector.multi_reduction <add>, %13, %cst_8 [1] : vector<4x256xf32> to vector<4xf32>
    %15 = vector.shape_cast %14 : vector<4xf32> to vector<4x1xf32>
    %cst_9 = arith.constant 3.906250e-03 : f32
    %16 = vector.broadcast %cst_9 : f32 to vector<4x1xf32>
    %17 = arith.mulf %15, %16 : vector<4x1xf32>
    %cst_10 = arith.constant 9.99999974E-6 : f32
    %18 = vector.broadcast %cst_10 : f32 to vector<4x1xf32>
    %19 = arith.addf %17, %18 : vector<4x1xf32>
    %20 = math.rsqrt %19 : vector<4x1xf32>
    %21 = vector.broadcast %20 : vector<4x1xf32> to vector<4x256xf32>
    %22 = arith.mulf %12, %21 : vector<4x256xf32>
    %cst_11 = arith.constant 0.000000e+00 : f32
    %23 = vector.broadcast %cst_11 : f32 to vector<4x256xf32>
    %24 = arith.maximumf %22, %23 : vector<4x256xf32>
    %25 = tpu.iota {dimensions = array<i32: 1>} : vector<4x256xi32>
    %c16_i32 = arith.constant 16 : i32
    %c0_i32 = arith.constant 0 : i32
    %26 = arith.cmpi eq, %c16_i32, %c0_i32 : i32
    %c1_i32 = arith.constant 1 : i32
    %27 = arith.select %26, %c1_i32, %c16_i32 : i32
    %28 = vector.broadcast %27 : i32 to vector<4x256xi32>
    %29 = arith.remsi %25, %28 : vector<4x256xi32>
    %c0_i32_12 = arith.constant 0 : i32
    %30 = vector.broadcast %c0_i32_12 : i32 to vector<4x256xi32>
    %31 = arith.cmpi ne, %29, %30 : vector<4x256xi32>
    %c0_i32_13 = arith.constant 0 : i32
    %32 = vector.broadcast %c0_i32_13 : i32 to vector<4x256xi32>
    %33 = arith.cmpi slt, %29, %32 : vector<4x256xi32>
    %c0_i32_14 = arith.constant 0 : i32
    %34 = arith.cmpi slt, %27, %c0_i32_14 : i32
    %35 = vector.broadcast %34 : i1 to vector<4x256xi1>
    %36 = vector.broadcast %35 : vector<4x256xi1> to vector<4x256xi1>
    %37 = arith.xori %33, %36 : vector<4x256xi1>
    %38 = arith.andi %37, %31 : vector<4x256xi1>
    %39 = vector.broadcast %27 : i32 to vector<4x256xi32>
    %40 = arith.addi %29, %39 : vector<4x256xi32>
    %41 = arith.select %38, %40, %29 : vector<4x256xi1>, vector<4x256xi32>
    %c0_i32_15 = arith.constant 0 : i32
    %42 = vector.broadcast %c0_i32_15 : i32 to vector<4x256xi32>
    %43 = arith.cmpi eq, %41, %42 : vector<4x256xi32>
    %c15_i32 = arith.constant 15 : i32
    %44 = vector.broadcast %c15_i32 : i32 to vector<4x256xi32>
    %45 = arith.cmpi eq, %41, %44 : vector<4x256xi32>
    %c16_i32_16 = arith.constant 16 : i32
    %46 = vector.broadcast %c16_i32_16 : i32 to vector<4x256xi32>
    %47 = arith.cmpi slt, %25, %46 : vector<4x256xi32>
    %c240_i32 = arith.constant 240 : i32
    %48 = vector.broadcast %c240_i32 : i32 to vector<4x256xi32>
    %49 = arith.cmpi sge, %25, %48 : vector<4x256xi32>
    %c240_i32_17 = arith.constant 240 : i32
    %50 = tpu.dynamic_rotate %24 by %c240_i32_17 dim 1 : vector<4x256xf32>, i32 -> vector<4x256xf32>
    %c16_i32_18 = arith.constant 16 : i32
    %51 = tpu.dynamic_rotate %24 by %c16_i32_18 dim 1 : vector<4x256xf32>, i32 -> vector<4x256xf32>
    %52 = arith.select %47, %50, %51 : vector<4x256xi1>, vector<4x256xf32>
    %53 = arith.select %49, %51, %50 : vector<4x256xi1>, vector<4x256xf32>
    %cst_19 = arith.constant 0.000000e+00 : f32
    %54 = vector.broadcast %cst_19 : f32 to vector<4x256xf32>
    %c255_i32 = arith.constant 255 : i32
    %55 = tpu.dynamic_rotate %52 by %c255_i32 dim 1 : vector<4x256xf32>, i32 -> vector<4x256xf32>
    %c1_i32_20 = arith.constant 1 : i32
    %56 = tpu.dynamic_rotate %52 by %c1_i32_20 dim 1 : vector<4x256xf32>, i32 -> vector<4x256xf32>
    %57 = arith.select %43, %55, %56 : vector<4x256xi1>, vector<4x256xf32>
    %58 = arith.select %45, %56, %55 : vector<4x256xi1>, vector<4x256xf32>
    %c0_21 = arith.constant 0 : index
    %c0_22 = arith.constant 0 : index
    %c0_23 = arith.constant 0 : index
    %59 = vector.load %arg4[%c0_21, %c0_22, %c0_23] : memref<9x4x4xf32, #tpu.memory_space<vmem>>, vector<1x4x4xf32>
    %60 = vector.shape_cast %59 : vector<1x4x4xf32> to vector<4x4xf32>
    %cst_24 = arith.constant dense<0.000000e+00> : vector<4x256xf32>
    %61 = tpu.matmul %60, %57, %cst_24 {dimension_numbers = #tpu.dot_dimension_numbers<[1], [0], [0], [1], [0, 0, 1, 1], [], []>} : vector<4x4xf32>, vector<4x256xf32>, vector<4x256xf32> -> vector<4x256xf32>
    %62 = arith.addf %54, %61 : vector<4x256xf32>
    %c1 = arith.constant 1 : index
    %c0_25 = arith.constant 0 : index
    %c0_26 = arith.constant 0 : index
    %63 = vector.load %arg4[%c1, %c0_25, %c0_26] : memref<9x4x4xf32, #tpu.memory_space<vmem>>, vector<1x4x4xf32>
    %64 = vector.shape_cast %63 : vector<1x4x4xf32> to vector<4x4xf32>
    %cst_27 = arith.constant dense<0.000000e+00> : vector<4x256xf32>
    %65 = tpu.matmul %64, %52, %cst_27 {dimension_numbers = #tpu.dot_dimension_numbers<[1], [0], [0], [1], [0, 0, 1, 1], [], []>} : vector<4x4xf32>, vector<4x256xf32>, vector<4x256xf32> -> vector<4x256xf32>
    %66 = arith.addf %62, %65 : vector<4x256xf32>
    %c2 = arith.constant 2 : index
    %c0_28 = arith.constant 0 : index
    %c0_29 = arith.constant 0 : index
    %67 = vector.load %arg4[%c2, %c0_28, %c0_29] : memref<9x4x4xf32, #tpu.memory_space<vmem>>, vector<1x4x4xf32>
    %68 = vector.shape_cast %67 : vector<1x4x4xf32> to vector<4x4xf32>
    %cst_30 = arith.constant dense<0.000000e+00> : vector<4x256xf32>
    %69 = tpu.matmul %68, %58, %cst_30 {dimension_numbers = #tpu.dot_dimension_numbers<[1], [0], [0], [1], [0, 0, 1, 1], [], []>} : vector<4x4xf32>, vector<4x256xf32>, vector<4x256xf32> -> vector<4x256xf32>
    %70 = arith.addf %66, %69 : vector<4x256xf32>
    %c255_i32_31 = arith.constant 255 : i32
    %71 = tpu.dynamic_rotate %24 by %c255_i32_31 dim 1 : vector<4x256xf32>, i32 -> vector<4x256xf32>
    %c1_i32_32 = arith.constant 1 : i32
    %72 = tpu.dynamic_rotate %24 by %c1_i32_32 dim 1 : vector<4x256xf32>, i32 -> vector<4x256xf32>
    %73 = arith.select %43, %71, %72 : vector<4x256xi1>, vector<4x256xf32>
    %74 = arith.select %45, %72, %71 : vector<4x256xi1>, vector<4x256xf32>
    %c3 = arith.constant 3 : index
    %c0_33 = arith.constant 0 : index
    %c0_34 = arith.constant 0 : index
    %75 = vector.load %arg4[%c3, %c0_33, %c0_34] : memref<9x4x4xf32, #tpu.memory_space<vmem>>, vector<1x4x4xf32>
    %76 = vector.shape_cast %75 : vector<1x4x4xf32> to vector<4x4xf32>
    %cst_35 = arith.constant dense<0.000000e+00> : vector<4x256xf32>
    %77 = tpu.matmul %76, %73, %cst_35 {dimension_numbers = #tpu.dot_dimension_numbers<[1], [0], [0], [1], [0, 0, 1, 1], [], []>} : vector<4x4xf32>, vector<4x256xf32>, vector<4x256xf32> -> vector<4x256xf32>
    %78 = arith.addf %70, %77 : vector<4x256xf32>
    %c4 = arith.constant 4 : index
    %c0_36 = arith.constant 0 : index
    %c0_37 = arith.constant 0 : index
    %79 = vector.load %arg4[%c4, %c0_36, %c0_37] : memref<9x4x4xf32, #tpu.memory_space<vmem>>, vector<1x4x4xf32>
    %80 = vector.shape_cast %79 : vector<1x4x4xf32> to vector<4x4xf32>
    %cst_38 = arith.constant dense<0.000000e+00> : vector<4x256xf32>
    %81 = tpu.matmul %80, %24, %cst_38 {dimension_numbers = #tpu.dot_dimension_numbers<[1], [0], [0], [1], [0, 0, 1, 1], [], []>} : vector<4x4xf32>, vector<4x256xf32>, vector<4x256xf32> -> vector<4x256xf32>
    %82 = arith.addf %78, %81 : vector<4x256xf32>
    %c5 = arith.constant 5 : index
    %c0_39 = arith.constant 0 : index
    %c0_40 = arith.constant 0 : index
    %83 = vector.load %arg4[%c5, %c0_39, %c0_40] : memref<9x4x4xf32, #tpu.memory_space<vmem>>, vector<1x4x4xf32>
    %84 = vector.shape_cast %83 : vector<1x4x4xf32> to vector<4x4xf32>
    %cst_41 = arith.constant dense<0.000000e+00> : vector<4x256xf32>
    %85 = tpu.matmul %84, %74, %cst_41 {dimension_numbers = #tpu.dot_dimension_numbers<[1], [0], [0], [1], [0, 0, 1, 1], [], []>} : vector<4x4xf32>, vector<4x256xf32>, vector<4x256xf32> -> vector<4x256xf32>
    %86 = arith.addf %82, %85 : vector<4x256xf32>
    %c255_i32_42 = arith.constant 255 : i32
    %87 = tpu.dynamic_rotate %53 by %c255_i32_42 dim 1 : vector<4x256xf32>, i32 -> vector<4x256xf32>
    %c1_i32_43 = arith.constant 1 : i32
    %88 = tpu.dynamic_rotate %53 by %c1_i32_43 dim 1 : vector<4x256xf32>, i32 -> vector<4x256xf32>
    %89 = arith.select %43, %87, %88 : vector<4x256xi1>, vector<4x256xf32>
    %90 = arith.select %45, %88, %87 : vector<4x256xi1>, vector<4x256xf32>
    %c6 = arith.constant 6 : index
    %c0_44 = arith.constant 0 : index
    %c0_45 = arith.constant 0 : index
    %91 = vector.load %arg4[%c6, %c0_44, %c0_45] : memref<9x4x4xf32, #tpu.memory_space<vmem>>, vector<1x4x4xf32>
    %92 = vector.shape_cast %91 : vector<1x4x4xf32> to vector<4x4xf32>
    %cst_46 = arith.constant dense<0.000000e+00> : vector<4x256xf32>
    %93 = tpu.matmul %92, %89, %cst_46 {dimension_numbers = #tpu.dot_dimension_numbers<[1], [0], [0], [1], [0, 0, 1, 1], [], []>} : vector<4x4xf32>, vector<4x256xf32>, vector<4x256xf32> -> vector<4x256xf32>
    %94 = arith.addf %86, %93 : vector<4x256xf32>
    %c7 = arith.constant 7 : index
    %c0_47 = arith.constant 0 : index
    %c0_48 = arith.constant 0 : index
    %95 = vector.load %arg4[%c7, %c0_47, %c0_48] : memref<9x4x4xf32, #tpu.memory_space<vmem>>, vector<1x4x4xf32>
    %96 = vector.shape_cast %95 : vector<1x4x4xf32> to vector<4x4xf32>
    %cst_49 = arith.constant dense<0.000000e+00> : vector<4x256xf32>
    %97 = tpu.matmul %96, %53, %cst_49 {dimension_numbers = #tpu.dot_dimension_numbers<[1], [0], [0], [1], [0, 0, 1, 1], [], []>} : vector<4x4xf32>, vector<4x256xf32>, vector<4x256xf32> -> vector<4x256xf32>
    %98 = arith.addf %94, %97 : vector<4x256xf32>
    %c8 = arith.constant 8 : index
    %c0_50 = arith.constant 0 : index
    %c0_51 = arith.constant 0 : index
    %99 = vector.load %arg4[%c8, %c0_50, %c0_51] : memref<9x4x4xf32, #tpu.memory_space<vmem>>, vector<1x4x4xf32>
    %100 = vector.shape_cast %99 : vector<1x4x4xf32> to vector<4x4xf32>
    %cst_52 = arith.constant dense<0.000000e+00> : vector<4x256xf32>
    %101 = tpu.matmul %100, %90, %cst_52 {dimension_numbers = #tpu.dot_dimension_numbers<[1], [0], [0], [1], [0, 0, 1, 1], [], []>} : vector<4x4xf32>, vector<4x256xf32>, vector<4x256xf32> -> vector<4x256xf32>
    %102 = arith.addf %98, %101 : vector<4x256xf32>
    %c0_53 = arith.constant 0 : index
    %c0_54 = arith.constant 0 : index
    %103 = vector.load %arg5[%c0_53, %c0_54] : memref<4x1xf32, #tpu.memory_space<vmem>>, vector<4x1xf32>
    %104 = vector.broadcast %103 : vector<4x1xf32> to vector<4x256xf32>
    %105 = arith.addf %102, %104 : vector<4x256xf32>
    %cst_55 = arith.constant dense<0.000000e+00> : vector<4xf32>
    %106 = vector.multi_reduction <add>, %105, %cst_55 [1] : vector<4x256xf32> to vector<4xf32>
    %107 = vector.shape_cast %106 : vector<4xf32> to vector<4x1xf32>
    %cst_56 = arith.constant 3.906250e-03 : f32
    %108 = vector.broadcast %cst_56 : f32 to vector<4x1xf32>
    %109 = arith.mulf %107, %108 : vector<4x1xf32>
    %110 = vector.broadcast %109 : vector<4x1xf32> to vector<4x256xf32>
    %111 = arith.subf %105, %110 : vector<4x256xf32>
    %112 = arith.mulf %111, %111 : vector<4x256xf32>
    %cst_57 = arith.constant dense<0.000000e+00> : vector<4xf32>
    %113 = vector.multi_reduction <add>, %112, %cst_57 [1] : vector<4x256xf32> to vector<4xf32>
    %114 = vector.shape_cast %113 : vector<4xf32> to vector<4x1xf32>
    %cst_58 = arith.constant 3.906250e-03 : f32
    %115 = vector.broadcast %cst_58 : f32 to vector<4x1xf32>
    %116 = arith.mulf %114, %115 : vector<4x1xf32>
    %cst_59 = arith.constant 9.99999974E-6 : f32
    %117 = vector.broadcast %cst_59 : f32 to vector<4x1xf32>
    %118 = arith.addf %116, %117 : vector<4x1xf32>
    %119 = math.rsqrt %118 : vector<4x1xf32>
    %120 = vector.broadcast %119 : vector<4x1xf32> to vector<4x256xf32>
    %121 = arith.mulf %111, %120 : vector<4x256xf32>
    %c0_60 = arith.constant 0 : index
    %c16 = arith.constant 16 : index
    %c0_61 = arith.constant 0 : index
    %122 = vector.load %arg1[%c0_60, %c16, %c0_61] : memref<1x36x256xf32, #tpu.memory_space<vmem>>, vector<1x4x256xf32>
    %123 = vector.shape_cast %122 : vector<1x4x256xf32> to vector<4x256xf32>
    %124 = arith.addf %123, %121 : vector<4x256xf32>
    %c0_62 = arith.constant 0 : index
    %c0_63 = arith.constant 0 : index
    %c0_64 = arith.constant 0 : index
    %125 = vector.load %arg6[%c0_62, %c0_63, %c0_64] : memref<1x4x256xf32, #tpu.memory_space<vmem>>, vector<1x4x256xf32>
    %126 = vector.shape_cast %125 : vector<1x4x256xf32> to vector<4x256xf32>
    %127 = vector.shape_cast %124 : vector<4x256xf32> to vector<1x4x256xf32>
    tpu.vector_store %arg6[%c0_62, %c0_63, %c0_64], %127 {strides = array<i32>} : memref<1x4x256xf32, #tpu.memory_space<vmem>>, vector<1x4x256xf32>,
    return
  }
  func.func @transform_0(%arg0: i32) -> (i32, i32, i32) {
    %c0_i32 = arith.constant 0 : i32
    %c0_i32_0 = arith.constant 0 : i32
    %c0_i32_1 = arith.constant 0 : i32
    return %arg0, %c0_i32, %c0_i32_0 : i32, i32, i32
  }
  func.func @transform_1(%arg0: i32) -> (i32, i32) {
    %c0_i32 = arith.constant 0 : i32
    %c0_i32_0 = arith.constant 0 : i32
    %c0_i32_1 = arith.constant 0 : i32
    return %c0_i32, %c0_i32_0 : i32, i32
  }
  func.func @transform_2(%arg0: i32) -> (i32, i32) {
    %c0_i32 = arith.constant 0 : i32
    %c0_i32_0 = arith.constant 0 : i32
    %c0_i32_1 = arith.constant 0 : i32
    return %c0_i32, %c0_i32_0 : i32, i32
  }
  func.func @transform_3(%arg0: i32) -> (i32, i32, i32) {
    %c0_i32 = arith.constant 0 : i32
    %c0_i32_0 = arith.constant 0 : i32
    %c0_i32_1 = arith.constant 0 : i32
    %c0_i32_2 = arith.constant 0 : i32
    return %c0_i32, %c0_i32_0, %c0_i32_1 : i32, i32, i32
  }
  func.func @transform_4(%arg0: i32) -> (i32, i32) {
    %c0_i32 = arith.constant 0 : i32
    %c0_i32_0 = arith.constant 0 : i32
    %c0_i32_1 = arith.constant 0 : i32
    return %c0_i32, %c0_i32_0 : i32, i32
  }
  func.func @transform_5(%arg0: i32) -> (i32, i32, i32) {
    %c0_i32 = arith.constant 0 : i32
    %c0_i32_0 = arith.constant 0 : i32
    %c0_i32_1 = arith.constant 0 : i32
    return %arg0, %c0_i32, %c0_i32_0 : i32, i32, i32
  }
}

</mosaic_0001>

<bundles_post_ra>
// kernel: tpu_custom_call.1
= control target key start
LH: loop header
LB: loop body
LE: loop exit
PB: predicated region body
PF: predicated region fallthrough
CT: control target
= control target key end

     0   :  { %10 = vsyncpa [#allocation3], 0  ;;  %s1842_s0 = inlined_call_operand.vmem [shape: f32[2,36,256], index: 0, kind: input, shape index: {}]   ;;  %s1843_s1 = inlined_call_operand.vmem [shape: f32[4,36], index: 1, kind: input, shape index: {}]   ;;  %s1844_s2 = inlined_call_operand.vmem [shape: f32[4,1], index: 2, kind: input, shape index: {}]   ;;  %s1845_s3 = inlined_call_operand.vmem [shape: f32[9,4,4], index: 3, kind: input, shape index: {}]   ;;  %s1846_s4 = inlined_call_operand.vmem [shape: f32[4,1], index: 4, kind: input, shape index: {}]   ;;  %s1847_s5 = inlined_call_operand.hbm [shape: f32[2,4,256], index: 5, kind: output, shape index: {}]  }
   0x1   :  { %12 = vsyncpa [#allocation3 + $0x1], 0  ;;  %s1536_s18 = smov 0   ;;  %s1538_s19 = smov 0  }
   0x2   :  { %s1540_s20 = smov 0   ;;  %s1542_s21 = smov 0  }
   0x3 LB: > { %s1557_s22 = sadd.s32 4294967295, %s1497_s21   ;;  %s1309_s23 = sadd.s32 4294967294, %s1497_s21   ;;  %s1497_s21 = sphi %s1542_s21, %s1861_s21   ;;  %s1493_s20 = sphi %s1540_s20, %s1860_s20   ;;  %s1489_s19 = sphi %s1538_s19, %s1859_s19   ;;  %s1485_s18 = sphi %s1536_s18, %s1858_s18  }
   0x4   : > { %s1561_s24 = sadd.s32 1, %s1497_s21   ;;  %s135_s25 = sadd.s32 1, %s1493_s20 }
   0x5   : > { %s132_s26 = ssub.s32 %s1497_s21, %s1561_s24  ;;  %p145_p0 = scmp.ne.s32.totalorder %s1493_s20, %s1489_s19 }
   0x6   : > { %p133_p1 = scmp.eq.s32.totalorder %s132_s26, 0  ;;  %p146_p2 = scmp.eq.s32.totalorder %s1557_s22, 1 }
   0x7   : > { %p151_p3 = scmp.ne.s32.totalorder %s1489_s19, %s1485_s18  ;;  %p152_p4 = scmp.eq.s32.totalorder %s1309_s23, 1 }
   0x8   : > { %s1572_s27 = scalar_select %p133_p1, %s1493_s20, %s135_s25  }
   0x9   : > { %p1574_p5 = por %p146_p2, %p145_p0  ;;  %p1578_p6 = por %p152_p4, %p151_p3 }
   0xa   : > { %p1312_p7 = scmp.ge.s32.totalorder %s1497_s21, 1  ;;  %p190_p8 = scmp.lt.s32.totalorder %s1497_s21, 3 }
   0xc   : > { %p191_p9 = pnand %p1312_p7, %p190_p8 }
   0xd   : > { %p218_p10 = scmp.lt.s32.totalorder (!%p191_p9), %s1557_s22, 1  ;;  %v1499_v0 = vmov (!%p191_p9), 0.0   ;;  %v234_v1 = vld [vmem:[%s1844_s2] sm:$0xf] (!%p191_p9)  ;;  %v1500_v2 = vmov (!%p191_p9), 0   ;;  %vm244_vm0 = vcmask (!%p191_p9), 1043456   ;;  %v344_v43 = vlaneseq (!%p191_p9) }
   0xe   : > { %194 = sbr.rel (%p191_p9) target bundleno = 1383 (0x567), region = 40  ;;  %315 = vmatprep.mubr.f32.mxu0 (!%p191_p9), %v1499_v0  ;;  %753 = vmatprep.mubr.f32.mxu1 (!%p191_p9), %v1499_v0  ;;  %v223_v17 = vld [vmem:[%s1843_s1] sm:$0xf] (!%p191_p9)  ;;  %vm240_vm1 = vcmask (!%p191_p9), 293888   ;;  %s1501_s14 = smov (!%p191_p9), 127   ;;  %vm417_vm5 = vcmask (!%p191_p9), 31744  }
   0xf   : > { %1429 = vset.pattern.permute.xlu0 (!%p191_p9), %v1500_v2  ;;  %1430 = vset.pattern.permute.xlu1 (!%p191_p9), %v1500_v2  ;;  %s1502_s15 = smov (!%p191_p9), 112   ;;  %s1503_s16 = smov (!%p191_p9), 16   ;;  %v1632_v44 = vand.u32 (!%p191_p9), 127, %v344_v43  ;;  %v1318_v54 = vld [vmem:[%s1845_s3 + $0x4] sm:$0xf] (!%p191_p9) }
  0x10   : > { %237 = vperm.xlu0 (!%p191_p9), %1429, %v234_v1   ;;  %s1504_s17 = smov (!%p191_p9), 1   ;;  %v1325_v43 = vld [vmem:[%s1845_s3 + $0x8] sm:$0xf] (!%p191_p9)  ;;  %s1358_s9 = sshll.u32 (!%p191_p9), %s1557_s22, 7 }
  0x11   : > { %vm383_vm2 = vcmp.lt.s32.totalorder (!%p191_p9), %v1632_v44, 112  ;;  %v346_v48 = vadd.s32 (!%p191_p9), 128, %v1632_v44  ;;  %vm375_vm3 = vcmp.lt.s32.totalorder (!%p191_p9), %v1632_v44, 16  ;;  %v351_v58 = vand.u32 (!%p191_p9), 15, %v1632_v44 }
  0x12   : > { %vm400_vm6 = vcmp.lt.s32.totalorder (!%p191_p9), %v1632_v44, 127  ;;  %vm407_vm7 = vcmp.lt.s32.totalorder (!%p191_p9), %v1632_v44, 1  ;;  %v1349_v44 = vld [vmem:[%s1845_s3 + $0x20] sm:$0xf] (!%p191_p9) }
  0x13   : > { %vm378_vm4 = vcmp.ge.s32.totalorder (!%p191_p9), %v346_v48, 240  ;;  %v358_v59 = vand.u32 (!%p191_p9), 15, %v346_v48  ;;  %vm1667_vm9 = vcmp.eq.s32.totalorder (!%p191_p9), %v351_v58, 0  ;;  %vm1705_vm11 = vcmp.eq.s32.totalorder (!%p191_p9), %v351_v58, 15 }
  0x15   : > { %s219_s7 = scalar_select %p218_p10, %s1557_s22, 1  ;;  %vm1663_vm8 = vcmp.eq.s32.totalorder %v358_v59, 0  ;;  %vm1691_vm10 = vcmp.eq.s32.totalorder %v358_v59, 15 }
  0x16   : > { %s1505_s22 = smov [#allocation2]  }
  0x17   : > { %s1383_s8 = smul.u32 80, %s219_s7  ;;  %s215_s7 = sand.u32 1, %s1489_s19  }
  0x19   : > { %s1594_s11 = scalar_lea.vmem %s1842_s0, %s1383_s8  ;;  %s1313_s8 = sshll.u32 %s215_s7, 3 }
  0x1a   : > { %v225_v3 = vld [vmem:[%s1594_s11 + $0x8] sm:$0xff]  ;;  %v227_v4 = vld [vmem:[%s1594_s11 + $0x18] sm:$0xff]  ;;  %v224_v5 = vld [vmem:[%s1594_s11] sm:$0xff]  ;;  %s217_s10 = scalar_lea.vmem [#allocation2], %s1313_s8 }
  0x1b   : > { %v1359_v6 = vpack.c.bf16 %v227_v4, %v225_v3  ;;  %v226_v7 = vld [vmem:[%s1594_s11 + $0x10] sm:$0xff]  ;;  %v229_v8 = vld [vmem:[%s1594_s11 + $0x28] sm:$0xff]  ;;  %v231_v9 = vld [vmem:[%s1594_s11 + $0x38] sm:$0xff]  ;;  %s1250_s12 = sshll.u32 %s217_s10, 4  ;;  %s1802_s12 = int_to_ptr.vmem [resolvable:$true] %s1250_s12 }
  0x1c   : > { %v1361_v10 = vpack.c.bf16 %v226_v7, %v224_v5  ;;  %v1363_v11 = vpack.c.bf16 %v231_v9, %v229_v8  ;;  %v228_v12 = vld [vmem:[%s1594_s11 + $0x20] sm:$0xff]  ;;  %v230_v13 = vld [vmem:[%s1594_s11 + $0x30] sm:$0xff]  ;;  %v233_v15 = vld [vmem:[%s1594_s11 + $0x48] sm:$0xf] }
  0x1d   : > { %1360 = vmatprep.subr.bf16.mxu0 %v1359_v6  ;;  %v1365_v14 = vpack.c.bf16 %v230_v13, %v228_v12  ;;  %v232_v16 = vld [vmem:[%s1594_s11 + $0x40] sm:$0xf]  ;;  %v1329_v9 = vld [vmem:[%s1845_s3 + $0xc] sm:$0xf]  ;;  %v1333_v13 = vld [vmem:[%s1845_s3 + $0x10] sm:$0xf] }
  0x1e   : > { %1362 = vmatpush1.bf16.msra.mxu0 %v1361_v10  ;;  %v1198_v6 = vld [vmem:[%s1846_s4] sm:$0xf] }
  0x1f   : > { %1364 = vmatprep.subr.bf16.mxu0 %v1363_v11 }
  0x22   : > { %1366 = vmatpush1.bf16.msra.mxu0 %v1365_v14 }
  0x23   : > { %1315 = vmatprep.subr.msk.mxu0 %vm244_vm0, %v233_v15  ;;  %v1337_v15 = vld [vmem:[%s1845_s3 + $0x14] sm:$0xf] }
  0x26   : > { %1316 = vmatpush1.msk.msra.mxu0 %vm244_vm0, %v232_v16 }
  0x27   : > { %1317 = vmatmul.mubr.msk.f32.vlgmr.msra.gmra.mrb[0].mxu0 %vm240_vm1, %v223_v17 }
  0x28   : > { %491 = vmatprep.mubr.f32.mxu0 %v1499_v0 }
  0x8f   : > { %v238_v18 = vpop.permute.xlu0 %237 }
  0xfa   : > { %v317_v19 = vpop.f32.mrb[0].mxu0 }
  0xfb   : > { %v318_v20 = vadd.f32 %v317_v19, %v238_v18  ;;  %v319_v21 = vpop.f32.mrb[1].mxu0 }
  0xfc   : > { %v320_v22 = vadd.f32 %v319_v21, %v238_v18 }
  0xfd   : > { %v322_v23 = vsel %vm244_vm0, %v318_v20, 0.0 }
  0xfe   : > { %v323_v24 = vsel %vm244_vm0, %v320_v22, 0.0 }
  0xff   : > { %v324_v25 = vadd.f32 %v323_v24, %v322_v23 }
 0x101   : > { %325 = vadd.xlane.f32.xlu0 %v324_v25 }
 0x18e   : > { %v326_v26 = vpop.xlane.xlu0 %325 }
 0x18f   : > { %v327_v27 = vmul.f32 0.00390625, %v326_v26  ;;  %v1341_v26 = vld [vmem:[%s1845_s3 + $0x18] sm:$0xf] }
 0x191   : > { %v328_v28 = vsub.f32 %v318_v20, %v327_v27  ;;  %v329_v29 = vsub.f32 %v320_v22, %v327_v27 }
 0x193   : > { %v330_v30 = vmul.f32 %v328_v28, %v328_v28  ;;  %v331_v31 = vmul.f32 %v329_v29, %v329_v29 }
 0x195   : > { %v332_v32 = vsel %vm244_vm0, %v330_v30, 0.0  ;;  %v333_v33 = vsel %vm244_vm0, %v331_v31, 0.0 }
 0x196   : > { %v334_v34 = vadd.f32 %v333_v33, %v332_v32 }
 0x198   : > { %335 = vadd.xlane.f32.xlu1 %v334_v34 }
 0x225   : > { %v336_v35 = vpop.xlane.xlu1 %335 }
 0x226   : > { %v337_v36 = vmul.f32 0.00390625, %v336_v35 }
 0x228   : > { %v338_v37 = vadd.f32 1e-05, %v337_v36 }
 0x22a   : > { %1431 = vrsqrt.f32 %v338_v37 }
 0x234   : > { %v1432_v38 = vpop.eup %1431 }
 0x235   : > { %v341_v39 = vmul.f32 %v1432_v38, %v329_v29  ;;  %v340_v40 = vmul.f32 %v1432_v38, %v328_v28  ;;  %v414_v38 = vld [vmem:[%s1845_s3] sm:$0xf] }
 0x237   : > { %v1616_v41 = vmax.f32 %v341_v39, 0.0  ;;  %v1618_v42 = vmax.f32 %v340_v40, 0.0  ;;  %v1345_v39 = vld [vmem:[%s1845_s3 + $0x1c] sm:$0xf] }
 0x239   : > { %664 = vrot.lane.b32.xlu0 %v1616_v41, %s1501_s14  ;;  %379 = vrot.lane.b32.xlu1 %v1618_v42, %s1502_s15 }
 0x23d   : > { %381 = vrot.lane.b32.xlu1 %v1616_v41, %s1502_s15  ;;  %s1800_s15 = scalar_lea.hbm %s1847_s5, %s1358_s9 }
 0x241   : > { %386 = vrot.lane.b32.xlu1 %v1618_v42, %s1503_s16 }
 0x245   : > { %388 = vrot.lane.b32.xlu1 %v1616_v41, %s1503_s16  ;;  %s1435_s16 = scalar_lea.vmem %s1802_s12, 128 }
 0x246   : > { %p1436_p11 = scmp.ne.s32.totalorder %s1802_s12, %s1435_s16 }
 0x248   : > { %p1437_p12 = pnand %p1436_p11, %p1574_p5 }
 0x249   : > { %662 = vrot.lane.b32.xlu1 %v1618_v42, %s1501_s14 }
 0x24a   : > { %p1438_p13 = pneg %p1437_p12 }
 0x24d   : > { %668 = vrot.lane.b32.xlu1 %v1618_v42, %s1504_s17 }
 0x251   : > { %670 = vrot.lane.b32.xlu1 %v1616_v41, %s1504_s17 }
 0x2ab   : > { %v380_v45 = vpop.permute.xlu1 %379  ;;  %v665_v63 = vpop.permute.xlu0 %664 }
 0x2af   : > { %v382_v46 = vpop.permute.xlu1 %381 }
 0x2b0   : > { %v1635_v47 = vsel %vm383_vm2, %v380_v45, %v382_v46  ;;  %v385_v51 = vsel %vm383_vm2, %v382_v46, %v380_v45 }
 0x2b1   : > { %930 = vrot.lane.b32.xlu1 %v1635_v47, %s1501_s14 }
 0x2b3   : > { %v387_v49 = vpop.permute.xlu1 %386 }
 0x2b5   : > { %936 = vrot.lane.b32.xlu1 %v1635_v47, %s1504_s17 }
 0x2b7   : > { %v389_v50 = vpop.permute.xlu1 %388 }
 0x2b8   : > { %v390_v52 = vsel %vm375_vm3, %v387_v49, %v389_v50  ;;  %v391_v53 = vsel %vm375_vm3, %v389_v50, %v387_v49 }
 0x2b9   : > { %v392_v55 = vsel %vm375_vm3, %v1635_v47, %v391_v53  ;;  %1319 = vmatprep.subr.msk.mxu0 %vm244_vm0, %v390_v52  ;;  %v1648_v56 = vsel %vm378_vm4, %v390_v52, %v385_v51 }
 0x2ba   : > { %1320 = vmatpush1.msk.msra.mxu0 %vm244_vm0, %v392_v55  ;;  %938 = vrot.lane.b32.xlu0 %v1648_v56, %s1504_s17 }
 0x2bb   : > { %932 = vrot.lane.b32.xlu1 %v1648_v56, %s1501_s14  ;;  %v663_v57 = vpop.permute.xlu1 %662  ;;  %1321 = vmatmul.mubr.msk.f32.vlgmr.msra.gmra.mrb[2].mxu0 %vm417_vm5, %v1318_v54 }
 0x2bc   : > { %571 = vmatprep.mubr.f32.mxu0 %v1499_v0  ;;  %v666_v2 = vsel %vm400_vm6, %v663_v57, %v665_v63  ;;  %v667_v3 = vsel %vm400_vm6, %v665_v63, %v663_v57 }
 0x2be   : > { %398 = vrot.lane.b32.xlu0 %v390_v52, %s1501_s14 }
 0x2bf   : > { %396 = vrot.lane.b32.xlu1 %v392_v55, %s1501_s14  ;;  %v669_v60 = vpop.permute.xlu1 %668 }
 0x2c2   : > { %405 = vrot.lane.b32.xlu0 %v390_v52, %s1504_s17 }
 0x2c3   : > { %403 = vrot.lane.b32.xlu1 %v392_v55, %s1504_s17  ;;  %v671_v1 = vpop.permute.xlu1 %670  ;;  %s1439_s17 = sshll.u32 %s1505_s22, 4  ;;  %s1440_s17 = int_to_ptr.vmem [resolvable:$false] %s1439_s17 }
 0x2c4   : > { %v672_v4 = vsel %vm407_vm7, %v669_v60, %v671_v1  ;;  %v673_v5 = vsel %vm407_vm7, %v671_v1, %v669_v60  ;;  %s1441_s23 = scalar_lea.vmem %s1440_s17, 256  ;;  %p1442_p0 = scmp.lt.s32.totalorder %s1802_s12, %s1440_s17 }
 0x2c5   : > { %v675_v7 = vsel %vm1663_vm8, %v667_v3, %v672_v4  ;;  %v674_v8 = vsel %vm1667_vm9, %v666_v2, %v673_v5  ;;  %v677_v11 = vsel %vm1691_vm10, %v672_v4, %v667_v3  ;;  %v676_v14 = vsel %vm1705_vm11, %v673_v5, %v666_v2  ;;  %p1443_p1 = scmp.lt.s32.totalorder %s1441_s23, %s1435_s16 }
 0x2c6   : > { %1330 = vmatprep.subr.msk.mxu1 %vm244_vm0, %v675_v7  ;;  %v1227_v7 = vld [vmem:[%s1594_s11 + $0x28] sm:$0xf] }
 0x2c7   : > { %1331 = vmatpush1.msk.msra.mxu1 %vm244_vm0, %v674_v8  ;;  %1201 = vperm.xlu1 %1430, %v1198_v6   ;;  %v1226_v6 = vld [vmem:[%s1594_s11 + $0x20] sm:$0xf]  ;;  %s1236_s11 = scalar_lea.sflag [#allocation3], %s215_s7  ;;  %p1444_p2 = por %p1443_p1, %p1442_p0 }
 0x2c8   : > { %1332 = vmatmul.mubr.msk.f32.vlgmr.msra.gmra.mrb[0].mxu1 %vm417_vm5, %v1329_v9  ;;  %1334 = vmatprep.subr.msk.mxu1 %vm244_vm0, %v1616_v41 }
 0x2c9   : > { %1335 = vmatpush1.msk.msra.mxu1 %vm244_vm0, %v1618_v42  ;;  %837 = vmatprep.mubr.f32.mxu1 %v1499_v0  ;;  %p1445_p3 = pnand %p1444_p2, %p1438_p13 }
 0x2ca   : > { %1338 = vmatprep.subr.msk.mxu1 %vm244_vm0, %v677_v11 }
 0x2d0   : > { %1336 = vmatmul.mubr.msk.f32.vlgmr.msra.gmra.mrb[0].mxu1 %vm417_vm5, %v1333_v13 }
 0x2d1   : > { %1339 = vmatpush1.msk.msra.mxu1 %vm244_vm0, %v676_v14  ;;  %921 = vmatprep.mubr.f32.mxu1 %v1499_v0 }
 0x2d8   : > { %1340 = vmatmul.mubr.msk.f32.vlgmr.msra.gmra.mrb[0].mxu1 %vm417_vm5, %v1337_v15 }
 0x2d9   : > { %1021 = vmatprep.mubr.f32.mxu1 %v1499_v0 }
 0x323   : > { %v931_v16 = vpop.permute.xlu1 %930 }
 0x327   : > { %v937_v17 = vpop.permute.xlu1 %936 }
 0x32c   : > { %v939_v18 = vpop.permute.xlu0 %938 }
 0x32d   : > { %v940_v19 = vsel %vm407_vm7, %v937_v17, %v939_v18  ;;  %v941_v20 = vsel %vm407_vm7, %v939_v18, %v937_v17  ;;  %v933_v21 = vpop.permute.xlu1 %932 }
 0x32e   : > { %v934_v22 = vsel %vm400_vm6, %v931_v16, %v933_v21  ;;  %v935_v23 = vsel %vm400_vm6, %v933_v21, %v931_v16 }
 0x32f   : > { %v942_v24 = vsel %vm1667_vm9, %v934_v22, %v941_v20  ;;  %v943_v25 = vsel %vm1663_vm8, %v935_v23, %v940_v19  ;;  %v945_v29 = vsel %vm1691_vm10, %v940_v19, %v935_v23  ;;  %v944_v42 = vsel %vm1705_vm11, %v941_v20, %v934_v22 }
 0x330   : > { %1342 = vmatprep.subr.msk.mxu1 %vm244_vm0, %v943_v25  ;;  %v399_v27 = vpop.permute.xlu0 %398 }
 0x331   : > { %1343 = vmatpush1.msk.msra.mxu1 %vm244_vm0, %v942_v24  ;;  %v397_v28 = vpop.permute.xlu1 %396 }
 0x332   : > { %1344 = vmatmul.mubr.msk.f32.vlgmr.msra.gmra.mrb[0].mxu1 %vm417_vm5, %v1341_v26  ;;  %1346 = vmatprep.subr.msk.mxu1 %vm244_vm0, %v1648_v56  ;;  %v401_v32 = vsel %vm400_vm6, %v397_v28, %v399_v27  ;;  %v402_v33 = vsel %vm400_vm6, %v399_v27, %v397_v28 }
 0x333   : > { %1347 = vmatpush1.msk.msra.mxu1 %vm244_vm0, %v1635_v47  ;;  %1105 = vmatprep.mubr.f32.mxu1 %v1499_v0 }
 0x334   : > { %1350 = vmatprep.subr.msk.mxu1 %vm244_vm0, %v945_v29  ;;  %v406_v30 = vpop.permute.xlu0 %405 }
 0x335   : > { %v404_v31 = vpop.permute.xlu1 %403 }
 0x336   : > { %v408_v34 = vsel %vm407_vm7, %v404_v31, %v406_v30  ;;  %v409_v35 = vsel %vm407_vm7, %v406_v30, %v404_v31 }
 0x337   : > { %v410_v36 = vsel %vm1667_vm9, %v401_v32, %v409_v35  ;;  %v411_v37 = vsel %vm1663_vm8, %v402_v33, %v408_v34  ;;  %v413_v40 = vsel %vm1691_vm10, %v408_v34, %v402_v33  ;;  %v412_v41 = vsel %vm1705_vm11, %v409_v35, %v401_v32 }
 0x338   : > { %1322 = vmatprep.subr.msk.mxu0 %vm244_vm0, %v411_v37 }
 0x339   : > { %1323 = vmatpush1.msk.msra.mxu0 %vm244_vm0, %v410_v36 }
 0x33a   : > { %1324 = vmatmul.mubr.msk.f32.vlgmr.msra.gmra.mrb[2].mxu0 %vm417_vm5, %v414_v38  ;;  %1326 = vmatprep.subr.msk.mxu0 %vm244_vm0, %v413_v40 }
 0x33b   : > { %1348 = vmatmul.mubr.msk.f32.vlgmr.msra.gmra.mrb[0].mxu1 %vm417_vm5, %v1345_v39  ;;  %1327 = vmatpush1.msk.msra.mxu0 %vm244_vm0, %v412_v41 }
 0x33c   : > { %1351 = vmatpush1.msk.msra.mxu1 %vm244_vm0, %v944_v42  ;;  %653 = vmatprep.mubr.f32.mxu0 %v1499_v0 }
 0x33d   : > { %1189 = vmatprep.mubr.f32.mxu1 %v1499_v0 }
 0x342   : > { %1328 = vmatmul.mubr.msk.f32.vlgmr.msra.gmra.mrb[2].mxu0 %vm417_vm5, %v1325_v43 }
 0x343   : > { %1352 = vmatmul.mubr.msk.f32.vlgmr.msra.gmra.mrb[0].mxu1 %vm417_vm5, %v1349_v44 }
 0x346   : > { %v1202_v46 = vpop.permute.xlu1 %1201 }
 0x415   : > { %v655_v45 = vpop.f32.mrb[2].mxu0 }
 0x416   : > { %v1191_v47 = vpop.f32.mrb[0].mxu1  ;;  %v657_v48 = vpop.f32.mrb[3].mxu0 }
 0x417   : > { %v1367_v49 = vadd.f32 %v1191_v47, %v655_v45  ;;  %v1193_v50 = vpop.f32.mrb[1].mxu1 }
 0x418   : > { %v1368_v51 = vadd.f32 %v1193_v50, %v657_v48 }
 0x419   : > { %v1204_v0 = vadd.f32 %v1367_v49, %v1202_v46 }
 0x41a   : > { %v1205_v52 = vadd.f32 %v1368_v51, %v1202_v46 }
 0x41b   : > { %v1206_v53 = vsel %vm244_vm0, %v1204_v0, 0.0 }
 0x41c   : > { %v1207_v54 = vsel %vm244_vm0, %v1205_v52, 0.0 }
 0x41d   : > { %v1208_v55 = vadd.f32 %v1207_v54, %v1206_v53 }
 0x41f   : > { %1209 = vadd.xlane.f32.xlu0 %v1208_v55 }
 0x4ac   : > { %v1210_v56 = vpop.xlane.xlu0 %1209 }
 0x4ad   : > { %v1211_v57 = vmul.f32 0.00390625, %v1210_v56 }
 0x4af   : > { %v1212_v58 = vsub.f32 %v1204_v0, %v1211_v57  ;;  %v1213_v59 = vsub.f32 %v1205_v52, %v1211_v57 }
 0x4b1   : > { %v1214_v60 = vmul.f32 %v1212_v58, %v1212_v58  ;;  %v1215_v61 = vmul.f32 %v1213_v59, %v1213_v59 }
 0x4b3   : > { %v1216_v62 = vsel %vm244_vm0, %v1214_v60, 0.0  ;;  %v1217_v63 = vsel %vm244_vm0, %v1215_v61, 0.0 }
 0x4b4   : > { %v1218_v1 = vadd.f32 %v1217_v63, %v1216_v62 }
 0x4b6   : > { %1219 = vadd.xlane.f32.xlu1 %v1218_v1 }
 0x543   : > { %v1220_v2 = vpop.xlane.xlu1 %1219 }
 0x544   : > { %v1221_v3 = vmul.f32 0.00390625, %v1220_v2 }
 0x546   : > { %v1222_v4 = vadd.f32 1e-05, %v1221_v3 }
 0x548   : > { %1433 = vrsqrt.f32 %v1222_v4 }
 0x552   : > { %v1434_v5 = vpop.eup %1433 }
 0x553   : > { %v1224_v8 = vmul.f32 %v1434_v5, %v1212_v58  ;;  %v1225_v9 = vmul.f32 %v1434_v5, %v1213_v59 }
 0x555   : > { %v1228_v10 = vadd.f32 %v1226_v6, %v1224_v8  ;;  %v1229_v11 = vadd.f32 %v1227_v7, %v1225_v9 }
 0x557   : > { %v1232_v12 = vcombine.low %v1228_v10, %v1229_v11 }
 0x559   : > { %1234 = vst [vmem:[%s217_s10] sm:$0xff] %v1232_v12 }
 0x55a   : > { %1448 = shalt.err (!%p1445_p3)
}
 0x55b   : > { %s1449_s25 = scalar_lea.hbm %s1800_s15, 128  ;;  %s1453_s6 = scalar_lea.hbm %s1847_s5, 256 }
 0x55c   : > { %p1450_p4 = scmp.ne.s32.totalorder %s1800_s15, %s1449_s25  ;;  %p1454_p9 = scmp.lt.u32.totalorder %s1800_s15, %s1847_s5 }
 0x55d   : > { %p1455_p10 = scmp.lt.u32.totalorder %s1453_s6, %s1449_s25  ;;  %p1457_p12 = scmp.lt.u32.totalorder %s1449_s25, %s1800_s15 }
 0x55e   : > { %p1451_p7 = pnand %p1450_p4, %p1574_p5 }
 0x55f   : > { %p1456_p11 = por %p1455_p10, %p1454_p9 }
 0x560   : > { %p1452_p8 = pneg %p1451_p7 }
 0x561   : > { %p1458_p13 = por %p1457_p12, %p1456_p11 }
 0x563   : > { %p1459_p0 = pnand %p1458_p13, %p1452_p8 }
 0x565   : > { %1462 = shalt.err (!%p1459_p0)
}
 0x566   : > { %1384 = dma.vmem_to_hbm [thread:$0]  (%p1574_p5), %s1802_s12, 128, %s1800_s15, %s1236_s11  }
 0x567 PF: > { %p1390_p1 = scmp.ge.s32.totalorder %s1497_s21, 2  ;;  %s1262_s9 = sand.u32 1, %s1485_s18  }
 0x568   : > { %s1263_s10 = scalar_lea.sflag [#allocation3], %s1262_s9 }
 0x569   : > { %p1387_p2 = pnand %p1390_p1, %p1578_p6 }
 0x56b   : > { %1480 = dma.done.wait (!%p1387_p2), %s1263_s10, 128  }
 0x56c   : > { %1482 = vsyncadd (!%p1387_p2), %s1263_s10, 4294967168  ;;  %p15_p3 = scmp.ge.s32.totalorder %s1561_s24, 4   ;;  %s1858_s18 = smov %s1489_s19 }
 0x56d   : > { %s1859_s19 = smov %s1493_s20  ;;  %s1860_s20 = smov %s1572_s27 }
 0x56e   : > { %s1861_s21 = smov %s1561_s24  ;;  %17 = sbr.rel (!%p15_p3) target bundleno = 3 (0x3), region = 83 }
 0x575   :  { %1268 = vsyncpa [#allocation3], 1 }
 0x576   :  { %1270 = vsyncpa [#allocation3 + $0x1], 1 }

</bundles_post_ra>
